<compile_context>
chip_gen: v6e
topology: v6e:2x2x1
jax: 0.10.0
libtpu: 0.0.40
codegen_flags: <defaults>
</compile_context>

<pallas_src>
import jax
import jax.numpy as jnp
from jax import lax
from jax.experimental import pallas as pl
from jax.experimental.pallas import tpu as pltpu

LANE = 128
_TARGET_TILE_COLS = 4096   # lane-tile target; >=512 lanes already ~85% of HBM roofline


def _shift_lanes(x, shift):
    """jnp.roll semantics along the last (lane) axis, static shift."""
    n = x.shape[-1]
    s = shift % n
    if s == 0:
        return x
    return pltpu.roll(x, s, 1)


def _upsample_block_kernel(K, pad_left, L2, Lpp, C_out, compute_dtype):
    """K = double-conv kernel size, pad_left = (K-1)//2, Lpp = per-sample slab width."""

    def kernel(x_ref, f_ref, wt_ref, bt_ref, w1_ref, b1_ref, w2_ref, b2_ref,
               out_ref, z_scratch):
        cols = x_ref.shape[-1]

        # ---- in-kernel masks (no HBM traffic).  Tiles are slab-aligned, so the
        # masks are periodic in Lpp and need no program_id column offset.
        lp = lax.broadcasted_iota(jnp.int32, (C_out, cols), 1) % Lpp
        valid = (lp >= pad_left) & (lp < pad_left + L2)          # real output cols
        even = valid & (((lp + pad_left) % 2) == 0)              # upsampled parity

        xup = x_ref[...]        # (C_in, cols) 2x-repeated, halo-padded input

        # ---- ConvTranspose1d(kernel=2, stride=2) + bias ---------------------
        # out[:, 2i+k] = Wt[k] @ x[:, i]; xup repeats every x column twice, so
        # one resident-weight matmul per k over the whole tile + a parity vsel.
        y0 = jnp.dot(wt_ref[0], xup, preferred_element_type=jnp.float32)
        y1 = jnp.dot(wt_ref[1], xup, preferred_element_type=jnp.float32)
        up = jnp.where(valid, jnp.where(even, y0, y1) + bt_ref[...], 0.0)

        # concat([up, skip], channel) folded into a single sublane stack so each
        # conv1 tap is ONE matmul against the original (C_out, C_in) weight.
        # TODO(synk): Dropout(0.3) is identity in eval mode; a training-mode mask
        # would use pltpu.prng_random_bits + scale by 1/(1-p).
        z_scratch[:C_out, :] = up.astype(compute_dtype)
        z_scratch[C_out:, :] = f_ref[...]
        z = z_scratch[...]                                        # (C_in, cols)

        # ---- conv1 ('same') + bias + ReLU -----------------------------------
        acc1 = jnp.zeros((C_out, cols), jnp.float32)
        for k in range(K):                        # static unroll over taps
            tap = jnp.dot(w1_ref[k], z, preferred_element_type=jnp.float32)
            acc1 = acc1 + _shift_lanes(tap, pad_left - k)
        h = jnp.where(valid, jnp.maximum(acc1 + b1_ref[...], 0.0), 0.0)

        # ---- conv2 ('same') + bias + ReLU -----------------------------------
        hc = h.astype(compute_dtype)
        acc2 = jnp.zeros((C_out, cols), jnp.float32)
        for k in range(K):
            tap = jnp.dot(w2_ref[k], hc, preferred_element_type=jnp.float32)
            acc2 = acc2 + _shift_lanes(tap, pad_left - k)
        out_ref[...] = jnp.maximum(acc2 + b2_ref[...], 0.0).astype(out_ref.dtype)

    return kernel


def upsample1d_block(x, conv_features, wt, bt, w1, b1, w2, b2, *,
                     samples_per_tile=None, compute_dtype=jnp.float32):
    """UpSample1DBlock forward (eval mode).

    x:             (B, C_in, L)
    conv_features: (B, C_in - C_out, 2L)
    wt: (C_in, C_out, 2), bt: (C_out,)    ConvTranspose1d(k=2, s=2)
    w1: (C_out, C_in, K), b1: (C_out,)    first 'same' conv
    w2: (C_out, C_out, K), b2: (C_out,)   second 'same' conv
    compute_dtype: dtype of the MXU operands.  f32 = exact parity with the
        PyTorch module; bf16 halves HBM bytes / uses native MXU rate on v6e/v7x
        (accumulation and elementwise stay f32; ~1e-2 relative tolerance).
    returns (B, C_out, 2L) float32
    """
    B, C_in, L = x.shape
    C_out = wt.shape[1]
    C_feat = conv_features.shape[1]
    K = w1.shape[-1]
    assert C_feat + C_out == C_in == w1.shape[1]
    assert conv_features.shape == (B, C_feat, 2 * L)

    L2 = 2 * L
    pad_left = (K - 1) // 2
    Lp = L2 + K - 1                                  # sample width incl. 'same' halo
    Lpp = ((Lp + LANE - 1) // LANE) * LANE           # lane-aligned per-sample slab

    # Tile = T whole slabs: tiles are both 128-lane aligned and sample aligned
    # (the in-kernel roll/mask logic relies on slab-aligned tile boundaries).
    if samples_per_tile is None:
        samples_per_tile = max(1, min(B, _TARGET_TILE_COLS // Lpp))
    T = int(samples_per_tile)
    assert T >= 1
    Bp = ((B + T - 1) // T) * T                      # pad batch to whole tiles
    cols_tile = T * Lpp
    Ncols = Bp * Lpp
    grid = (Ncols // cols_tile,)

    # ---- layout plumbing (no FLOPs): 2x repeat realises the stride-2 transposed
    # conv, per-sample 'same' halo + lane padding, batch flattened into lanes.
    # TODO(synk): at production sizes fold this into the BlockSpec indexing
    # (grid over B, element-offset index_map) so the (C, Bp*Lpp) intermediates are
    # never materialized in HBM; here XLA fuses the pad/transpose into one copy.
    def to_cols(a):                                  # (B, C, 2L) -> (C, Ncols)
        a = jnp.pad(a, ((0, Bp - B), (0, 0), (pad_left, Lpp - L2 - pad_left)))
        return jnp.transpose(a, (1, 0, 2)).reshape(a.shape[1], Ncols)

    x_cols = to_cols(jnp.repeat(x, 2, axis=2)).astype(compute_dtype)   # (C_in, Ncols)
    f_cols = to_cols(conv_features).astype(compute_dtype)              # (C_feat, Ncols)

    # Weight re-layout: tap index leading => per-tap slices are free leading-dim
    # indexes; conv1 keeps the full C_in so the channel concat is a sublane stack.
    wt_k = jnp.transpose(wt, (2, 1, 0)).astype(compute_dtype)   # (2, C_out, C_in)
    w1_k = jnp.transpose(w1, (2, 0, 1)).astype(compute_dtype)   # (K, C_out, C_in)
    w2_k = jnp.transpose(w2, (2, 0, 1)).astype(compute_dtype)   # (K, C_out, C_out)
    bt_c = bt.reshape(C_out, 1).astype(jnp.float32)
    b1_c = b1.reshape(C_out, 1).astype(jnp.float32)
    b2_c = b2.reshape(C_out, 1).astype(jnp.float32)

    # ---- advisory VMEM budget & cost estimate --------------------------------
    in_item = jnp.dtype(compute_dtype).itemsize
    per_step_bytes = (
        2 * (C_in + C_feat) * cols_tile * in_item        # double-buffered inputs
        + 2 * C_out * cols_tile * 4                      # double-buffered output
        + (C_in + 4 * C_out) * cols_tile * 4             # live intermediates + scratch
        + (wt_k.size + w1_k.size + w2_k.size) * in_item)
    vmem_limit = int(min(max(2 * per_step_bytes + (1 << 20), 16 << 20), 64 << 20))

    flops = 2 * Ncols * C_out * (2 * C_in + K * C_in + K * C_out)
    bytes_accessed = ((C_in + C_feat) * Ncols * in_item
                      + C_out * Ncols * 4
                      + (wt_k.size + w1_k.size + w2_k.size) * in_item)

    kernel = _upsample_block_kernel(K, pad_left, L2, Lpp, C_out, compute_dtype)

    out_cols = pl.pallas_call(
        kernel,
        out_shape=jax.ShapeDtypeStruct((C_out, Ncols), jnp.float32),
        grid=grid,
        in_specs=[
            pl.BlockSpec((C_in, cols_tile), lambda i: (0, i)),      # x (lane-tiled)
            pl.BlockSpec((C_feat, cols_tile), lambda i: (0, i)),    # skip (lane-tiled)
            pl.BlockSpec(wt_k.shape, lambda i: (0, 0, 0)),          # resident weights
            pl.BlockSpec(bt_c.shape, lambda i: (0, 0)),
            pl.BlockSpec(w1_k.shape, lambda i: (0, 0, 0)),
            pl.BlockSpec(b1_c.shape, lambda i: (0, 0)),
            pl.BlockSpec(w2_k.shape, lambda i: (0, 0, 0)),
            pl.BlockSpec(b2_c.shape, lambda i: (0, 0)),
        ],
        out_specs=pl.BlockSpec((C_out, cols_tile), lambda i: (0, i)),
        scratch_shapes=[pltpu.VMEM((C_in, cols_tile), compute_dtype)],
        compiler_params=pltpu.CompilerParams(
            dimension_semantics=("parallel",),
            vmem_limit_bytes=vmem_limit),
        cost_estimate=pl.CostEstimate(
            flops=int(flops), transcendentals=0,
            bytes_accessed=int(bytes_accessed)),
    )(x_cols, f_cols, wt_k, bt_c, w1_k, b1_c, w2_k, b2_c)

    # Drop halo / alignment columns and padded samples; restore (B, C_out, 2L).
    out = out_cols.reshape(C_out, Bp, Lpp)[:, :B, pad_left:pad_left + L2]
    return jnp.transpose(out, (1, 0, 2))


def _reference(x, conv_features, wt, bt, w1, b1, w2, b2):
    """Pure-JAX UpSample1DBlock forward (eval mode), NCL layout."""
    B, _, L = x.shape
    C_out = wt.shape[1]
    # ConvTranspose1d(k=2, s=2): out[:, co, 2i+k] = sum_ci x[:, ci, i]*wt[ci, co, k] + bt
    y = jnp.einsum("bci,cok->boik", x, wt).reshape(B, C_out, 2 * L)
    y = y + bt[None, :, None]
    z = jnp.concatenate([y, conv_features], axis=1)
    # Dropout: identity in eval mode.

    def conv_relu(inp, w, b):
        k = w.shape[-1]
        pad_l = (k - 1) // 2
        pad_r = (k - 1) - pad_l
        o = lax.conv_general_dilated(
            inp, w, window_strides=(1,), padding=[(pad_l, pad_r)],
            dimension_numbers=("NCH", "OIH", "NCH"))
        return jnp.maximum(o + b[None, :, None], 0.0)

    return conv_relu(conv_relu(z, w1, b1), w2, b2)


if __name__ == "__main__":
    B, C_in, C_out, K, L = 4, 8, 4, 3, 24
    C_feat = C_in - C_out

    key = jax.random.PRNGKey(0)
    ks = jax.random.split(key, 8)
    x = jax.random.normal(ks[0], (B, C_in, L), dtype=jnp.float32)
    feats = jax.random.normal(ks[1], (B, C_feat, 2 * L), dtype=jnp.float32)
    wt = jax.random.normal(ks[2], (C_in, C_out, 2), dtype=jnp.float32) * 0.3
    bt = jax.random.normal(ks[3], (C_out,), dtype=jnp.float32) * 0.1
    w1 = jax.random.normal(ks[4], (C_out, C_in, K), dtype=jnp.float32) * 0.3
    b1 = jax.random.normal(ks[5], (C_out,), dtype=jnp.float32) * 0.1
    w2 = jax.random.normal(ks[6], (C_out, C_out, K), dtype=jnp.float32) * 0.3
    b2 = jax.random.normal(ks[7], (C_out,), dtype=jnp.float32) * 0.1

    ref = _reference(x, feats, wt, bt, w1, b1, w2, b2)

    # f32 MXU operands (exact parity with the f32 PyTorch module), 2-step grid.
    out = upsample1d_block(x, feats, wt, bt, w1, b1, w2, b2, samples_per_tile=2)
    out = jax.block_until_ready(out)
    assert out.shape == (B, C_out, 2 * L)
    err = float(jnp.max(jnp.abs(out - ref)))
    assert jnp.allclose(out, ref, atol=1e-3, rtol=1e-3), f"f32 max |diff| = {err}"

    # bf16 MXU operands (v6e/v7x byte-halving path), f32 accumulation/elementwise.
    out_bf16 = upsample1d_block(x, feats, wt, bt, w1, b1, w2, b2,
                                samples_per_tile=2, compute_dtype=jnp.bfloat16)
    out_bf16 = jax.block_until_ready(out_bf16)
    err_bf16 = float(jnp.max(jnp.abs(out_bf16 - ref)))
    assert jnp.allclose(out_bf16, ref, atol=3e-1, rtol=5e-2), \
        f"bf16 max |diff| = {err_bf16}"

    print("KERNEL_OK")
</pallas_src>

<mosaic_0001>
module attributes {stable_mosaic.version = 11 : i64} {
  func.func @kernel(%arg0: i32, %arg1: memref<8x256xf32, #tpu.memory_space<vmem>>, %arg2: memref<4x256xf32, #tpu.memory_space<vmem>>, %arg3: memref<2x4x8xf32, #tpu.memory_space<vmem>>, %arg4: memref<4x1xf32, #tpu.memory_space<vmem>>, %arg5: memref<3x4x8xf32, #tpu.memory_space<vmem>>, %arg6: memref<4x1xf32, #tpu.memory_space<vmem>>, %arg7: memref<3x4x4xf32, #tpu.memory_space<vmem>>, %arg8: memref<4x1xf32, #tpu.memory_space<vmem>>, %arg9: memref<4x256xf32, #tpu.memory_space<vmem>>, %arg10: memref<8x256xf32, #tpu.memory_space<vmem>>) attributes {dimension_semantics = [#tpu.dimension_semantics<parallel>], iteration_bounds = array<i64: 2>, scalar_prefetch = 0 : i64, scratch_operands = 1 : i64, tpu.core_type = #tpu.core_type<tc>, window_params = [{transform_indices = @transform_0, window_bounds = array<i64: 8, 256>}, {transform_indices = @transform_1, window_bounds = array<i64: 4, 256>}, {pipeline_mode = #tpu.pipeline_mode<synchronous>, transform_indices = @transform_2, window_bounds = array<i64: 2, 4, 8>}, {pipeline_mode = #tpu.pipeline_mode<synchronous>, transform_indices = @transform_3, window_bounds = array<i64: 4, 1>}, {pipeline_mode = #tpu.pipeline_mode<synchronous>, transform_indices = @transform_4, window_bounds = array<i64: 3, 4, 8>}, {pipeline_mode = #tpu.pipeline_mode<synchronous>, transform_indices = @transform_5, window_bounds = array<i64: 4, 1>}, {pipeline_mode = #tpu.pipeline_mode<synchronous>, transform_indices = @transform_6, window_bounds = array<i64: 3, 4, 4>}, {pipeline_mode = #tpu.pipeline_mode<synchronous>, transform_indices = @transform_7, window_bounds = array<i64: 4, 1>}, {transform_indices = @transform_8, window_bounds = array<i64: 4, 256>}]} {
    %0 = tpu.iota {dimensions = array<i32: 1>} : vector<4x256xi32>
    %c128_i32 = arith.constant 128 : i32
    %c0_i32 = arith.constant 0 : i32
    %1 = arith.cmpi eq, %c128_i32, %c0_i32 : i32
    %c1_i32 = arith.constant 1 : i32
    %2 = arith.select %1, %c1_i32, %c128_i32 : i32
    %3 = vector.broadcast %2 : i32 to vector<4x256xi32>
    %4 = arith.remsi %0, %3 : vector<4x256xi32>
    %c0_i32_0 = arith.constant 0 : i32
    %5 = vector.broadcast %c0_i32_0 : i32 to vector<4x256xi32>
    %6 = arith.cmpi ne, %4, %5 : vector<4x256xi32>
    %c0_i32_1 = arith.constant 0 : i32
    %7 = vector.broadcast %c0_i32_1 : i32 to vector<4x256xi32>
    %8 = arith.cmpi slt, %4, %7 : vector<4x256xi32>
    %c0_i32_2 = arith.constant 0 : i32
    %9 = arith.cmpi slt, %2, %c0_i32_2 : i32
    %10 = vector.broadcast %9 : i1 to vector<4x256xi1>
    %11 = vector.broadcast %10 : vector<4x256xi1> to vector<4x256xi1>
    %12 = arith.xori %8, %11 : vector<4x256xi1>
    %13 = arith.andi %12, %6 : vector<4x256xi1>
    %14 = vector.broadcast %2 : i32 to vector<4x256xi32>
    %15 = arith.addi %4, %14 : vector<4x256xi32>
    %16 = arith.select %13, %15, %4 : vector<4x256xi1>, vector<4x256xi32>
    %c1_i32_3 = arith.constant 1 : i32
    %17 = vector.broadcast %c1_i32_3 : i32 to vector<4x256xi32>
    %18 = arith.cmpi sge, %16, %17 : vector<4x256xi32>
    %c49_i32 = arith.constant 49 : i32
    %19 = vector.broadcast %c49_i32 : i32 to vector<4x256xi32>
    %20 = arith.cmpi slt, %16, %19 : vector<4x256xi32>
    %21 = arith.andi %18, %20 : vector<4x256xi1>
    %c1_i32_4 = arith.constant 1 : i32
    %22 = vector.broadcast %c1_i32_4 : i32 to vector<4x256xi32>
    %23 = arith.addi %16, %22 : vector<4x256xi32>
    %c2_i32 = arith.constant 2 : i32
    %c0_i32_5 = arith.constant 0 : i32
    %24 = arith.cmpi eq, %c2_i32, %c0_i32_5 : i32
    %c1_i32_6 = arith.constant 1 : i32
    %25 = arith.select %24, %c1_i32_6, %c2_i32 : i32
    %26 = vector.broadcast %25 : i32 to vector<4x256xi32>
    %27 = arith.remsi %23, %26 : vector<4x256xi32>
    %c0_i32_7 = arith.constant 0 : i32
    %28 = vector.broadcast %c0_i32_7 : i32 to vector<4x256xi32>
    %29 = arith.cmpi ne, %27, %28 : vector<4x256xi32>
    %c0_i32_8 = arith.constant 0 : i32
    %30 = vector.broadcast %c0_i32_8 : i32 to vector<4x256xi32>
    %31 = arith.cmpi slt, %27, %30 : vector<4x256xi32>
    %c0_i32_9 = arith.constant 0 : i32
    %32 = arith.cmpi slt, %25, %c0_i32_9 : i32
    %33 = vector.broadcast %32 : i1 to vector<4x256xi1>
    %34 = vector.broadcast %33 : vector<4x256xi1> to vector<4x256xi1>
    %35 = arith.xori %31, %34 : vector<4x256xi1>
    %36 = arith.andi %35, %29 : vector<4x256xi1>
    %37 = vector.broadcast %25 : i32 to vector<4x256xi32>
    %38 = arith.addi %27, %37 : vector<4x256xi32>
    %39 = arith.select %36, %38, %27 : vector<4x256xi1>, vector<4x256xi32>
    %c0_i32_10 = arith.constant 0 : i32
    %40 = vector.broadcast %c0_i32_10 : i32 to vector<4x256xi32>
    %41 = arith.cmpi eq, %39, %40 : vector<4x256xi32>
    %42 = arith.andi %21, %41 : vector<4x256xi1>
    %c0 = arith.constant 0 : index
    %c0_11 = arith.constant 0 : index
    %43 = vector.load %arg1[%c0, %c0_11] : memref<8x256xf32, #tpu.memory_space<vmem>>, vector<8x256xf32>
    %c0_12 = arith.constant 0 : index
    %c0_13 = arith.constant 0 : index
    %c0_14 = arith.constant 0 : index
    %44 = vector.load %arg3[%c0_12, %c0_13, %c0_14] : memref<2x4x8xf32, #tpu.memory_space<vmem>>, vector<1x4x8xf32>
    %45 = vector.shape_cast %44 : vector<1x4x8xf32> to vector<4x8xf32>
    %cst = arith.constant dense<0.000000e+00> : vector<4x256xf32>
    %46 = tpu.matmul %45, %43, %cst {dimension_numbers = #tpu.dot_dimension_numbers<[1], [0], [0], [1], [0, 0, 1, 1], [], []>} : vector<4x8xf32>, vector<8x256xf32>, vector<4x256xf32> -> vector<4x256xf32>
    %c1 = arith.constant 1 : index
    %c0_15 = arith.constant 0 : index
    %c0_16 = arith.constant 0 : index
    %47 = vector.load %arg3[%c1, %c0_15, %c0_16] : memref<2x4x8xf32, #tpu.memory_space<vmem>>, vector<1x4x8xf32>
    %48 = vector.shape_cast %47 : vector<1x4x8xf32> to vector<4x8xf32>
    %cst_17 = arith.constant dense<0.000000e+00> : vector<4x256xf32>
    %49 = tpu.matmul %48, %43, %cst_17 {dimension_numbers = #tpu.dot_dimension_numbers<[1], [0], [0], [1], [0, 0, 1, 1], [], []>} : vector<4x8xf32>, vector<8x256xf32>, vector<4x256xf32> -> vector<4x256xf32>
    %50 = arith.select %42, %46, %49 : vector<4x256xi1>, vector<4x256xf32>
    %c0_18 = arith.constant 0 : index
    %c0_19 = arith.constant 0 : index
    %51 = vector.load %arg4[%c0_18, %c0_19] : memref<4x1xf32, #tpu.memory_space<vmem>>, vector<4x1xf32>
    %52 = vector.broadcast %51 : vector<4x1xf32> to vector<4x256xf32>
    %53 = arith.addf %50, %52 : vector<4x256xf32>
    %cst_20 = arith.constant 0.000000e+00 : f32
    %54 = vector.broadcast %cst_20 : f32 to vector<4x256xf32>
    %55 = arith.select %21, %53, %54 : vector<4x256xi1>, vector<4x256xf32>
    %c0_21 = arith.constant 0 : index
    %c0_22 = arith.constant 0 : index
    %56 = vector.load %arg10[%c0_21, %c0_22] : memref<8x256xf32, #tpu.memory_space<vmem>>, vector<4x256xf32>
    tpu.vector_store %arg10[%c0_21, %c0_22], %55 {strides = array<i32>} : memref<8x256xf32, #tpu.memory_space<vmem>>, vector<4x256xf32>,
    %c0_23 = arith.constant 0 : index
    %c0_24 = arith.constant 0 : index
    %57 = vector.load %arg2[%c0_23, %c0_24] : memref<4x256xf32, #tpu.memory_space<vmem>>, vector<4x256xf32>
    %c4 = arith.constant 4 : index
    %c0_25 = arith.constant 0 : index
    %58 = vector.load %arg10[%c4, %c0_25] : memref<8x256xf32, #tpu.memory_space<vmem>>, vector<4x256xf32>
    tpu.vector_store %arg10[%c4, %c0_25], %57 {strides = array<i32>} : memref<8x256xf32, #tpu.memory_space<vmem>>, vector<4x256xf32>,
    %c0_26 = arith.constant 0 : index
    %c0_27 = arith.constant 0 : index
    %59 = vector.load %arg10[%c0_26, %c0_27] : memref<8x256xf32, #tpu.memory_space<vmem>>, vector<8x256xf32>
    %cst_28 = arith.constant 0.000000e+00 : f32
    %60 = vector.broadcast %cst_28 : f32 to vector<4x256xf32>
    %c0_29 = arith.constant 0 : index
    %c0_30 = arith.constant 0 : index
    %c0_31 = arith.constant 0 : index
    %61 = vector.load %arg5[%c0_29, %c0_30, %c0_31] : memref<3x4x8xf32, #tpu.memory_space<vmem>>, vector<1x4x8xf32>
    %62 = vector.shape_cast %61 : vector<1x4x8xf32> to vector<4x8xf32>
    %cst_32 = arith.constant dense<0.000000e+00> : vector<4x256xf32>
    %63 = tpu.matmul %62, %59, %cst_32 {dimension_numbers = #tpu.dot_dimension_numbers<[1], [0], [0], [1], [0, 0, 1, 1], [], []>} : vector<4x8xf32>, vector<8x256xf32>, vector<4x256xf32> -> vector<4x256xf32>
    %c1_i32_33 = arith.constant 1 : i32
    %64 = tpu.dynamic_rotate %63 by %c1_i32_33 dim 1 : vector<4x256xf32>, i32 -> vector<4x256xf32>
    %65 = arith.addf %60, %64 : vector<4x256xf32>
    %c1_34 = arith.constant 1 : index
    %c0_35 = arith.constant 0 : index
    %c0_36 = arith.constant 0 : index
    %66 = vector.load %arg5[%c1_34, %c0_35, %c0_36] : memref<3x4x8xf32, #tpu.memory_space<vmem>>, vector<1x4x8xf32>
    %67 = vector.shape_cast %66 : vector<1x4x8xf32> to vector<4x8xf32>
    %cst_37 = arith.constant dense<0.000000e+00> : vector<4x256xf32>
    %68 = tpu.matmul %67, %59, %cst_37 {dimension_numbers = #tpu.dot_dimension_numbers<[1], [0], [0], [1], [0, 0, 1, 1], [], []>} : vector<4x8xf32>, vector<8x256xf32>, vector<4x256xf32> -> vector<4x256xf32>
    %69 = arith.addf %65, %68 : vector<4x256xf32>
    %c2 = arith.constant 2 : index
    %c0_38 = arith.constant 0 : index
    %c0_39 = arith.constant 0 : index
    %70 = vector.load %arg5[%c2, %c0_38, %c0_39] : memref<3x4x8xf32, #tpu.memory_space<vmem>>, vector<1x4x8xf32>
    %71 = vector.shape_cast %70 : vector<1x4x8xf32> to vector<4x8xf32>
    %cst_40 = arith.constant dense<0.000000e+00> : vector<4x256xf32>
    %72 = tpu.matmul %71, %59, %cst_40 {dimension_numbers = #tpu.dot_dimension_numbers<[1], [0], [0], [1], [0, 0, 1, 1], [], []>} : vector<4x8xf32>, vector<8x256xf32>, vector<4x256xf32> -> vector<4x256xf32>
    %c255_i32 = arith.constant 255 : i32
    %73 = tpu.dynamic_rotate %72 by %c255_i32 dim 1 : vector<4x256xf32>, i32 -> vector<4x256xf32>
    %74 = arith.addf %69, %73 : vector<4x256xf32>
    %c0_41 = arith.constant 0 : index
    %c0_42 = arith.constant 0 : index
    %75 = vector.load %arg6[%c0_41, %c0_42] : memref<4x1xf32, #tpu.memory_space<vmem>>, vector<4x1xf32>
    %76 = vector.broadcast %75 : vector<4x1xf32> to vector<4x256xf32>
    %77 = arith.addf %74, %76 : vector<4x256xf32>
    %cst_43 = arith.constant 0.000000e+00 : f32
    %78 = vector.broadcast %cst_43 : f32 to vector<4x256xf32>
    %79 = arith.maximumf %77, %78 : vector<4x256xf32>
    %cst_44 = arith.constant 0.000000e+00 : f32
    %80 = vector.broadcast %cst_44 : f32 to vector<4x256xf32>
    %81 = arith.select %21, %79, %80 : vector<4x256xi1>, vector<4x256xf32>
    %cst_45 = arith.constant 0.000000e+00 : f32
    %82 = vector.broadcast %cst_45 : f32 to vector<4x256xf32>
    %c0_46 = arith.constant 0 : index
    %c0_47 = arith.constant 0 : index
    %c0_48 = arith.constant 0 : index
    %83 = vector.load %arg7[%c0_46, %c0_47, %c0_48] : memref<3x4x4xf32, #tpu.memory_space<vmem>>, vector<1x4x4xf32>
    %84 = vector.shape_cast %83 : vector<1x4x4xf32> to vector<4x4xf32>
    %cst_49 = arith.constant dense<0.000000e+00> : vector<4x256xf32>
    %85 = tpu.matmul %84, %81, %cst_49 {dimension_numbers = #tpu.dot_dimension_numbers<[1], [0], [0], [1], [0, 0, 1, 1], [], []>} : vector<4x4xf32>, vector<4x256xf32>, vector<4x256xf32> -> vector<4x256xf32>
    %c1_i32_50 = arith.constant 1 : i32
    %86 = tpu.dynamic_rotate %85 by %c1_i32_50 dim 1 : vector<4x256xf32>, i32 -> vector<4x256xf32>
    %87 = arith.addf %82, %86 : vector<4x256xf32>
    %c1_51 = arith.constant 1 : index
    %c0_52 = arith.constant 0 : index
    %c0_53 = arith.constant 0 : index
    %88 = vector.load %arg7[%c1_51, %c0_52, %c0_53] : memref<3x4x4xf32, #tpu.memory_space<vmem>>, vector<1x4x4xf32>
    %89 = vector.shape_cast %88 : vector<1x4x4xf32> to vector<4x4xf32>
    %cst_54 = arith.constant dense<0.000000e+00> : vector<4x256xf32>
    %90 = tpu.matmul %89, %81, %cst_54 {dimension_numbers = #tpu.dot_dimension_numbers<[1], [0], [0], [1], [0, 0, 1, 1], [], []>} : vector<4x4xf32>, vector<4x256xf32>, vector<4x256xf32> -> vector<4x256xf32>
    %91 = arith.addf %87, %90 : vector<4x256xf32>
    %c2_55 = arith.constant 2 : index
    %c0_56 = arith.constant 0 : index
    %c0_57 = arith.constant 0 : index
    %92 = vector.load %arg7[%c2_55, %c0_56, %c0_57] : memref<3x4x4xf32, #tpu.memory_space<vmem>>, vector<1x4x4xf32>
    %93 = vector.shape_cast %92 : vector<1x4x4xf32> to vector<4x4xf32>
    %cst_58 = arith.constant dense<0.000000e+00> : vector<4x256xf32>
    %94 = tpu.matmul %93, %81, %cst_58 {dimension_numbers = #tpu.dot_dimension_numbers<[1], [0], [0], [1], [0, 0, 1, 1], [], []>} : vector<4x4xf32>, vector<4x256xf32>, vector<4x256xf32> -> vector<4x256xf32>
    %c255_i32_59 = arith.constant 255 : i32
    %95 = tpu.dynamic_rotate %94 by %c255_i32_59 dim 1 : vector<4x256xf32>, i32 -> vector<4x256xf32>
    %96 = arith.addf %91, %95 : vector<4x256xf32>
    %c0_60 = arith.constant 0 : index
    %c0_61 = arith.constant 0 : index
    %97 = vector.load %arg8[%c0_60, %c0_61] : memref<4x1xf32, #tpu.memory_space<vmem>>, vector<4x1xf32>
    %98 = vector.broadcast %97 : vector<4x1xf32> to vector<4x256xf32>
    %99 = arith.addf %96, %98 : vector<4x256xf32>
    %cst_62 = arith.constant 0.000000e+00 : f32
    %100 = vector.broadcast %cst_62 : f32 to vector<4x256xf32>
    %101 = arith.maximumf %99, %100 : vector<4x256xf32>
    %c0_63 = arith.constant 0 : index
    %c0_64 = arith.constant 0 : index
    %102 = vector.load %arg9[%c0_63, %c0_64] : memref<4x256xf32, #tpu.memory_space<vmem>>, vector<4x256xf32>
    tpu.vector_store %arg9[%c0_63, %c0_64], %101 {strides = array<i32>} : memref<4x256xf32, #tpu.memory_space<vmem>>, vector<4x256xf32>,
    return
  }
  func.func @transform_0(%arg0: i32) -> (i32, i32) {
    %c0_i32 = arith.constant 0 : i32
    %c0_i32_0 = arith.constant 0 : i32
    return %c0_i32, %arg0 : i32, i32
  }
  func.func @transform_1(%arg0: i32) -> (i32, i32) {
    %c0_i32 = arith.constant 0 : i32
    %c0_i32_0 = arith.constant 0 : i32
    return %c0_i32, %arg0 : i32, i32
  }
  func.func @transform_2(%arg0: i32) -> (i32, i32, i32) {
    %c0_i32 = arith.constant 0 : i32
    %c0_i32_0 = arith.constant 0 : i32
    %c0_i32_1 = arith.constant 0 : i32
    %c0_i32_2 = arith.constant 0 : i32
    return %c0_i32, %c0_i32_0, %c0_i32_1 : i32, i32, i32
  }
  func.func @transform_3(%arg0: i32) -> (i32, i32) {
    %c0_i32 = arith.constant 0 : i32
    %c0_i32_0 = arith.constant 0 : i32
    %c0_i32_1 = arith.constant 0 : i32
    return %c0_i32, %c0_i32_0 : i32, i32
  }
  func.func @transform_4(%arg0: i32) -> (i32, i32, i32) {
    %c0_i32 = arith.constant 0 : i32
    %c0_i32_0 = arith.constant 0 : i32
    %c0_i32_1 = arith.constant 0 : i32
    %c0_i32_2 = arith.constant 0 : i32
    return %c0_i32, %c0_i32_0, %c0_i32_1 : i32, i32, i32
  }
  func.func @transform_5(%arg0: i32) -> (i32, i32) {
    %c0_i32 = arith.constant 0 : i32
    %c0_i32_0 = arith.constant 0 : i32
    %c0_i32_1 = arith.constant 0 : i32
    return %c0_i32, %c0_i32_0 : i32, i32
  }
  func.func @transform_6(%arg0: i32) -> (i32, i32, i32) {
    %c0_i32 = arith.constant 0 : i32
    %c0_i32_0 = arith.constant 0 : i32
    %c0_i32_1 = arith.constant 0 : i32
    %c0_i32_2 = arith.constant 0 : i32
    return %c0_i32, %c0_i32_0, %c0_i32_1 : i32, i32, i32
  }
  func.func @transform_7(%arg0: i32) -> (i32, i32) {
    %c0_i32 = arith.constant 0 : i32
    %c0_i32_0 = arith.constant 0 : i32
    %c0_i32_1 = arith.constant 0 : i32
    return %c0_i32, %c0_i32_0 : i32, i32
  }
  func.func @transform_8(%arg0: i32) -> (i32, i32) {
    %c0_i32 = arith.constant 0 : i32
    %c0_i32_0 = arith.constant 0 : i32
    return %c0_i32, %arg0 : i32, i32
  }
}

</mosaic_0001>

<bundles_post_ra>
// kernel: tpu_custom_call.1
= control target key start
LH: loop header
LB: loop body
LE: loop exit
PB: predicated region body
PF: predicated region fallthrough
CT: control target
= control target key end

     0   :  { %s1898_s0 = inlined_call_operand.hbm [shape: f32[8,512], index: 0, kind: input, shape index: {}]   ;;  %s1899_s1 = inlined_call_operand.vmem [shape: f32[4,512], index: 1, kind: input, shape index: {}]   ;;  %s1900_s2 = inlined_call_operand.hbm [shape: f32[2,4,8], index: 2, kind: input, shape index: {}]   ;;  %s1901_s3 = inlined_call_operand.vmem [shape: f32[4,1], index: 3, kind: input, shape index: {}]   ;;  %s1902_s4 = inlined_call_operand.hbm [shape: f32[3,4,8], index: 4, kind: input, shape index: {}]   ;;  %s1903_s5 = inlined_call_operand.vmem [shape: f32[4,1], index: 5, kind: input, shape index: {}]   ;;  %s1904_s6 = inlined_call_operand.hbm [shape: f32[3,4,4], index: 6, kind: input, shape index: {}]   ;;  %s1905_s7 = inlined_call_operand.vmem [shape: f32[4,1], index: 7, kind: input, shape index: {}]   ;;  %s1906_s8 = inlined_call_operand.hbm [shape: f32[4,512], index: 8, kind: output, shape index: {}]  }
   0x1   :  { %1911 = sst [smem:[#allocation16_spill]] %s1900_s2 }
   0x2   :  { %1912 = sst [smem:[#allocation17_spill]] %s1902_s4 }
   0x3   :  { %1913 = sst [smem:[#allocation18_spill]] %s1904_s6 }
   0x4   :  { %13 = vsyncpa [#allocation4], 0 }
   0x5   :  { %15 = vsyncpa [#allocation4 + $0x1], 0 }
   0x6   :  { %16 = vsyncpa [#allocation7], 0 }
   0x7   :  { %17 = vsyncpa [#allocation10], 0 }
   0x8   :  { %18 = vsyncpa [#allocation5], 0 }
   0x9   :  { %20 = vsyncpa [#allocation5 + $0x1], 0  ;;  %s1642_s27 = smov 0   ;;  %s1644_s28 = smov 0  }
   0xa   :  { %s1646_s29 = smov 0   ;;  %s1648_s30 = smov 0  }
   0xb LB: > { %s1663_s9 = sadd.s32 4294967295, %s1584_s30   ;;  %s1282_s10 = sadd.s32 4294967294, %s1584_s30   ;;  %s1584_s30 = sphi %s1648_s30, %s1940_s30   ;;  %s1580_s29 = sphi %s1646_s29, %s1939_s29   ;;  %s1576_s28 = sphi %s1644_s28, %s1938_s28   ;;  %s1572_s27 = sphi %s1642_s27, %s1937_s27  }
   0xc   : > { %p46_p0 = scmp.ne.s32.totalorder %s1576_s28, %s1572_s27  ;;  %p1907_p1 = scmp.eq.s32.totalorder %s1663_s9, 0 }
   0xd   : > { %p228_p3 = scmp.eq.s32.totalorder %s1282_s10, 1  ;;  %p1283_p5 = scmp.ge.s32.totalorder %s1584_s30, 1 }
   0xe   : > { %p1672_p4 = por %p1907_p1, %p46_p0  ;;  %p235_p7 = scmp.lt.s32.totalorder %s1584_s30, 3 }
   0xf   : > { %p1677_p6 = por %p228_p3, %p46_p0  ;;  %s1586_s14 = smov [#allocation6]  }
  0x10   : > { %s1914_s11 = scalar_select %p1672_p4, 1, 0 }
  0x11   : > { %s1915_s12 = scalar_select %p1677_p6, 1, 0 }
  0x12   : > { %p1682_p8 = pnand %p1283_p5, %p235_p7  ;;  %s247_s15 = sshll.u32 %s1586_s14, 4  ;;  %s248_s15 = int_to_ptr.vmem [resolvable:$true] %s247_s15 }
  0x13   : > { %s1587_s17 = smov [#allocation8]   ;;  %s1588_s19 = smov [#allocation9]  }
  0x14   : > { %s1916_s13 = scalar_select %p1682_p8, 1, 0 }
  0x15   : > { %p1336_p9 = pneg %p1682_p8  ;;  %s263_s18 = sshll.u32 %s1587_s17, 4  ;;  %s264_s18 = int_to_ptr.vmem [resolvable:$true] %s263_s18 }
  0x16   : > { %s279_s20 = sshll.u32 %s1588_s19, 4  ;;  %s1417_s21 = scalar_lea.vmem %s248_s15, 128  ;;  %s280_s20 = int_to_ptr.vmem [resolvable:$true] %s279_s20 }
  0x17   : > { %p1691_p11 = pnand %p1336_p9, %p1907_p1  ;;  %p1418_p13 = scmp.ne.s32.totalorder %s248_s15, %s1417_s21 }
  0x18   : > { %p1425_p5 = scmp.lt.s32.totalorder %s248_s15, %s248_s15  ;;  %p1426_p7 = scmp.lt.s32.totalorder %s1417_s21, %s1417_s21 }
  0x19   : > { %p1408_p12 = pneg %p1691_p11 }
  0x1a   : > { %p1427_p9 = por %p1426_p7, %p1425_p5 }
  0x1b   : > { %p1420_p0 = pnand %p1418_p13, %p1408_p12 }
  0x1d   : > { %p1421_p3 = pneg %p1420_p0 }
  0x1f   : > { %p1428_p10 = pnand %p1427_p9, %p1421_p3 }
  0x21   : > { %1431 = shalt.err (!%p1428_p10)
}
  0x22   : > { %s1589_s22 = smov 64   ;;  %s1590_s23 = smov 4  }
  0x23   : > { %s1918_s2 = sld [smem:[#allocation16_spill]]  ;;  %s1443_s26 = scalar_lea.vmem %s264_s18, 192 }
  0x24   : > { %p1444_p1 = scmp.ne.s32.totalorder %s264_s18, %s1443_s26  ;;  %p1451_p2 = scmp.lt.s32.totalorder %s264_s18, %s264_s18 }
  0x25   : > { %p1452_p6 = scmp.lt.s32.totalorder %s1443_s26, %s1443_s26 }
  0x26   : > { %p1446_p13 = pnand %p1444_p1, %p1408_p12 }
  0x27   : > { %p1453_p5 = por %p1452_p6, %p1451_p2 }
  0x28   : > { %p1447_p0 = pneg %p1446_p13 }
  0x29   : > { %1339 = dma.hbm_to_vmem [thread:$0]  (!%p1691_p11), %s1918_s2, 128, %s248_s15, [#allocation7], %s1589_s22, %s1589_s22, %s1590_s23  }
  0x2a   : > { %p1454_p3 = pnand %p1453_p5, %p1447_p0 }
  0x2c   : > { %1457 = shalt.err (!%p1454_p3)
}
  0x2d   : > { %s1919_s4 = sld [smem:[#allocation17_spill]]  ;;  %s1469_s15 = scalar_lea.vmem %s280_s20, 192 }
  0x2e   : > { %p1470_p10 = scmp.ne.s32.totalorder %s280_s20, %s1469_s15  ;;  %p1477_p9 = scmp.lt.s32.totalorder %s280_s20, %s280_s20 }
  0x2f   : > { %p1478_p13 = scmp.lt.s32.totalorder %s1469_s15, %s1469_s15 }
  0x30   : > { %p1472_p7 = pnand %p1470_p10, %p1408_p12 }
  0x31   : > { %p1479_p4 = por %p1478_p13, %p1477_p9 }
  0x32   : > { %p1473_p1 = pneg %p1472_p7 }
  0x33   : > { %1342 = dma.hbm_to_vmem [thread:$0]  (!%p1691_p11), %s1919_s4, 192, %s264_s18, [#allocation7], %s1589_s22, %s1589_s22, %s1590_s23  }
  0x34   : > { %p1480_p2 = pnand %p1479_p4, %p1473_p1 }
  0x36   : > { %1483 = shalt.err (!%p1480_p2)
}
  0x37   : > { %s1920_s6 = sld [smem:[#allocation18_spill]]  ;;  %s1722_s18 = sadd.s32 1, %s1584_s30  }
  0x38   : > { %s30_s21 = ssub.s32 %s1584_s30, %s1722_s18  ;;  %s33_s16 = sadd.s32 1, %s1580_s29 }
  0x39   : > { %p31_p4 = scmp.eq.s32.totalorder %s30_s21, 0  ;;  %p40_p6 = scmp.ne.s32.totalorder %s1580_s29, %s1576_s28 }
  0x3a   : > { %p41_p12 = scmp.eq.s32.totalorder %s1584_s30, 0  ;;  %p1357_p0 = scmp.lt.s32.totalorder %s1584_s30, 2 }
  0x3b   : > { %s1732_s24 = scalar_select %p31_p4, %s1580_s29, %s33_s16  }
  0x3c   : > { %p42_p5 = por %p41_p12, %p40_p6  ;;  %p1921_p3 = scmp.eq.s32.totalorder %s1663_s9, 1 }
  0x3d   : > { %1345 = dma.hbm_to_vmem [thread:$0]  (!%p1691_p11), %s1920_s6, 192, %s280_s20, [#allocation10], %s1589_s22, %s1589_s22, %s1590_s23  }
  0x3e   : > { %p1736_p10 = por %p1921_p3, %p40_p6  ;;  %s296_s26 = sand.u32 1, %s1580_s29  }
  0x3f   : > { %s1318_s10 = sshll.u32 %s1584_s30, 8  ;;  %s1288_s20 = sshll.u32 %s296_s26, 4 }
  0x40   : > { %s1922_s25 = scalar_select %p1736_p10, 1, 0 }
  0x41   : > { %s1745_s14 = scalar_lea.hbm %s1898_s0, %s1318_s10  ;;  %s300_s15 = scalar_lea.vmem [#allocation3], %s1288_s20 }
  0x42   : > { %s308_s17 = sshll.u32 %s300_s15, 4  ;;  %p1747_p11 = pnand %p1357_p0, %p42_p5  ;;  %s309_s17 = int_to_ptr.vmem [resolvable:$true] %s308_s17 }
  0x43   : > { %s297_s21 = scalar_lea.sflag [#allocation4], %s296_s26  ;;  %s1484_s16 = scalar_lea.hbm %s1745_s14, 256 }
  0x44   : > { %p1485_p7 = scmp.ne.s32.totalorder %s1745_s14, %s1484_s16  ;;  %p1486_p1 = pneg %p1747_p11 }
  0x45   : > { %s1489_s23 = scalar_lea.hbm %s1898_s0, 512  ;;  %p1490_p2 = scmp.lt.s32.totalorder %s1745_s14, %s1898_s0 }
  0x46   : > { %p1487_p9 = pnand %p1486_p1, %p1485_p7  ;;  %p1491_p4 = scmp.lt.s32.totalorder %s1489_s23, %s1484_s16 }
  0x48   : > { %p1488_p13 = pneg %p1487_p9  ;;  %p1492_p6 = por %p1491_p4, %p1490_p2 }
  0x4a   : > { %p1493_p12 = pnand %p1492_p6, %p1488_p13 }
  0x4c   : > { %1496 = shalt.err (!%p1493_p12)
}
  0x4d   : > { %s1497_s15 = scalar_lea.vmem %s309_s17, 256  ;;  %s1591_s26 = smov [#allocation3]  }
  0x4e   : > { %p1498_p0 = scmp.ne.s32.totalorder %s309_s17, %s1497_s15  ;;  %s1502_s4 = sshll.u32 %s1591_s26, 4  ;;  %s1503_s4 = int_to_ptr.vmem [resolvable:$false] %s1502_s4 }
  0x4f   : > { %s1504_s6 = scalar_lea.vmem %s1503_s4, 512  ;;  %p1505_p7 = scmp.lt.s32.totalorder %s309_s17, %s1503_s4 }
  0x50   : > { %p1500_p5 = pnand %p1498_p0, %p1486_p1  ;;  %p1506_p9 = scmp.lt.s32.totalorder %s1504_s6, %s1497_s15 }
  0x52   : > { %p1501_p3 = pneg %p1500_p5  ;;  %p1507_p10 = por %p1506_p9, %p1505_p7 }
  0x54   : > { %p1508_p8 = pnand %p1507_p10, %p1501_p3 }
  0x56   : > { %1511 = shalt.err (!%p1508_p8)
}
  0x57   : > { %1349 = dma.hbm_to_vmem [thread:$0]  (!%p1747_p11), %s1745_s14, 256, %s309_s17, %s297_s21  }
  0x58   : > { %p1924_p13 = scmp.ne.s32.totalorder %s1916_s13, 0 }
  0x59   : > { %s1768_s2 = sand.u32 (!%p1924_p13), 1, %s1576_s28   ;;  %p1925_p1 = scmp.ne.s32.totalorder (!%p1924_p13), %s1914_s11, 0 }
  0x5a   : > { %326 = sbr.rel (%p1924_p13) target bundleno = 976 (0x3d0), region = 52  ;;  %s1292_s16 = sshll.u32 (!%p1924_p13), %s1768_s2, 4 }
  0x5b   : > { %s329_s10 = scalar_lea.sflag (!%p1924_p13), [#allocation4], %s1768_s2  ;;  %s332_s4 = scalar_lea.vmem (!%p1924_p13), [#allocation3], %s1292_s16 }
  0x5f   : > { %1555 = dma.done.wait (%p1925_p1), %s329_s10, 256  }
  0x60   : > { %1557 = vsyncadd (%p1925_p1), %s329_s10, 4294967040  ;;  %p1926_p8 = scmp.eq.s32.totalorder %s1663_s9, 0 }
  0x62   : > { %1559 = dma.done.wait (%p1926_p8), [#allocation7], 320   ;;  %p1927_p10 = pmov %p1926_p8 }
  0x63   : > { %p1928_p11 = pmov %p1926_p8 }
  0x64   : > { %1561 = vsyncadd (%p1927_p10), [#allocation7], 4294966976 }
  0x65   : > { %1563 = dma.done.wait (%p1928_p11), [#allocation10], 192   ;;  %p1929_p2 = pmov %p1926_p8 }
  0x66   : > { %v1592_v0 = vmov 0.0   ;;  %v1593_v1 = vmov 0   ;;  %v454_v2 = vld [vmem:[%s332_s4 + $0x8] sm:$0xff]  ;;  %v453_v3 = vld [vmem:[%s332_s4] sm:$0xff]  ;;  %vm456_vm0 = vcmask 64512   ;;  %s1297_s13 = sshll.u32 %s1663_s9, 1  ;;  %v390_v10 = vlaneseq }
  0x67   : > { %1565 = vsyncadd (%p1929_p2), [#allocation10], 4294967104  ;;  %524 = vmatprep.mubr.f32.mxu0 %v1592_v0  ;;  %600 = vmatprep.mubr.f32.mxu1 %v1592_v0  ;;  %v455_v4 = vld [vmem:[#allocation6] sm:$0xf]  ;;  %v532_v5 = vld [vmem:[#allocation6 + $0x4] sm:$0xf] }
  0x68   : > { %1403 = vset.pattern.permute.xlu0 %v1593_v1  ;;  %1404 = vset.pattern.permute.xlu1 %v1593_v1  ;;  %v609_v6 = vld [vmem:[%s1901_s3] sm:$0xf]  ;;  %p384_p4 = scmp.lt.s32.totalorder %s1297_s13, 3  ;;  %v1800_v11 = vand.u32 127, %v390_v10  ;;  %v629_v34 = vld [vmem:[#allocation8] sm:$0xf] }
  0x69   : > { %490 = vmatprep.subr.mxu0 %v454_v2  ;;  %566 = vmatprep.subr.mxu1 %v454_v2  ;;  %v876_v9 = vld [vmem:[%s1903_s5] sm:$0xf]  ;;  %v714_v36 = vld [vmem:[#allocation8 + $0x4] sm:$0xf]  ;;  %s1594_s20 = smov 1   ;;  %s1595_s15 = smov 127  }
  0x6a   : > { %491 = vmatpush1.msra.mxu0 %v453_v3  ;;  %567 = vmatpush1.msra.mxu1 %v453_v3  ;;  %s1942_s13 = smov (!%p384_p4, %s1297_s13), 3  ;;  %v392_v12 = vadd.s32 128, %v1800_v11  ;;  %v423_v16 = vadd.s32 1, %v1800_v11  ;;  %vm417_vm4 = vcmp.ge.s32.totalorder %v1800_v11, 1  ;;  %vm419_vm5 = vcmp.lt.s32.totalorder %v1800_v11, 49  ;;  %s1296_s10 = sshll.u32 %s1768_s2, 3 }
  0x6b   : > { %1299 = vmatmul.mubr.msk.f32.vlgmr.msra.gmra.mxu0 %vm456_vm0, %v455_v4  ;;  %1300 = vmatmul.mubr.msk.f32.vlgmr.msra.gmra.mxu1 %vm456_vm0, %v532_v5  ;;  %s1298_s14 = sshll.u32 %s1942_s13, 2  ;;  %vm1806_vm8 = vmand %vm417_vm4, %vm419_vm5  ;;  %v792_v37 = vld [vmem:[#allocation8 + $0x8] sm:$0xf]  ;;  %vm708_vm14 = vcmp.lt.s32.totalorder %v1800_v11, 1  ;;  %vm871_vm15 = vcmp.lt.s32.totalorder %v1800_v11, 127  ;;  %s1319_s4 = sshll.u32 %s1663_s9, 7 }
  0x6c   : > { %612 = vperm.xlu0 %1403, %v609_v6   ;;  %697 = vmatprep.mubr.f32.mxu0 %v1592_v0  ;;  %s387_s21 = scalar_lea.vmem %s1899_s1, %s1298_s14  ;;  %v404_v13 = vand.u32 127, %v392_v12  ;;  %v429_v18 = vand.u32 1, %v423_v16  ;;  %v1141_v42 = vld [vmem:[%s1905_s7] sm:$0xf]  ;;  %v888_v1 = vld [vmem:[#allocation9] sm:$0xf]  ;;  %s1169_s17 = scalar_lea.hbm %s1906_s8, %s1319_s4 }
  0x6d   : > { %782 = vmatprep.mubr.f32.mxu1 %v1592_v0  ;;  %v621_v7 = vld [vmem:[%s387_s21] sm:$0xff]  ;;  %879 = vperm.xlu1 %1404, %v876_v9   ;;  %v980_v2 = vld [vmem:[#allocation9 + $0x4] sm:$0xf]  ;;  %v1058_v3 = vld [vmem:[#allocation9 + $0x8] sm:$0xf]  ;;  %s381_s6 = scalar_lea.vmem [#allocation11], %s1296_s10 }
  0x6e   : > { %v623_v8 = vcombine.low %v621_v7, %v621_v7  ;;  %626 = vst [vmem:[#allocation2 + $0x8] sm:$0xf0] %v621_v7  ;;  %v424_v14 = vadd.s32 1, %v404_v13  ;;  %vm418_vm6 = vcmp.ge.s32.totalorder %v404_v13, 1  ;;  %vm420_vm7 = vcmp.lt.s32.totalorder %v404_v13, 49  ;;  %s1171_s11 = sshll.u32 %s381_s6, 4  ;;  %s1172_s11 = int_to_ptr.vmem [resolvable:$true] %s1171_s11 }
  0x6f   : > { %vm449_vm9 = vcmp.eq.s32.totalorder %v429_v18, 0  ;;  %vm1810_vm10 = vmand %vm418_vm6, %vm420_vm7  ;;  %s1157_s19 = scalar_lea.sflag [#allocation5], %s1768_s2  ;;  %s1512_s21 = scalar_lea.vmem %s1172_s11, 128 }
  0x70   : > { %625 = vst [vmem:[#allocation2] sm:$0xf0] %v623_v8  ;;  %v436_v15 = vand.u32 1, %v424_v14  ;;  %vm451_vm12 = vmand %vm1806_vm8, %vm449_vm9  ;;  %p1513_p6 = scmp.ne.s32.totalorder %s1172_s11, %s1512_s21  ;;  %p1934_p12 = scmp.ne.s32.totalorder %s1922_s25, 0 }
  0x71   : > { %s1596_s22 = smov [#allocation11]  }
  0x72   : > { %vm440_vm1 = vcmp.ne.s32.totalorder %v436_v15, 0  ;;  %vm442_vm2 = vcmp.lt.s32.totalorder %v436_v15, 0  ;;  %v446_v17 = vadd.s32 2, %v436_v15  ;;  %p1514_p0 = pnand %p1513_p6, %p1934_p12  ;;  %s1516_s23 = sshll.u32 %s1596_s22, 4  ;;  %s1517_s23 = int_to_ptr.vmem [resolvable:$false] %s1516_s23 }
  0x73   : > { %vm444_vm3 = vmand %vm442_vm2, %vm440_vm1  ;;  %vm889_vm1 = vcmask 31744   ;;  %s1518_s9 = scalar_lea.vmem %s1517_s23, 256  ;;  %p1519_p3 = scmp.lt.s32.totalorder %s1172_s11, %s1517_s23 }
  0x74   : > { %v448_v19 = vsel %vm444_vm3, %v446_v17, %v436_v15  ;;  %p1515_p5 = pneg %p1514_p0  ;;  %p1520_p7 = scmp.lt.s32.totalorder %s1518_s9, %s1512_s21 }
  0x75   : > { %vm450_vm11 = vcmp.eq.s32.totalorder %v448_v19, 0 }
  0x76   : > { %vm452_vm13 = vmand %vm1810_vm10, %vm450_vm11  ;;  %p1521_p9 = por %p1520_p7, %p1519_p3 }
  0x78   : > { %p1522_p13 = pnand %p1521_p9, %p1515_p5 }
  0xe7   : > { %v613_v22 = vpop.permute.xlu0 %612 }
  0xe8   : > { %v880_v43 = vpop.permute.xlu1 %879 }
 0x12b   : > { %v526_v23 = vpop.f32.mrf.mxu0  ;;  %v602_v24 = vpop.f32.mrf.mxu1 }
 0x12c   : > { %v607_v25 = vsel %vm451_vm12, %v526_v23, %v602_v24 }
 0x12d   : > { %v615_v26 = vadd.f32 %v613_v22, %v607_v25  ;;  %v528_v27 = vpop.f32.mrf.mxu0  ;;  %v604_v28 = vpop.f32.mrf.mxu1 }
 0x12e   : > { %v608_v29 = vsel %vm452_vm13, %v528_v27, %v604_v28 }
 0x12f   : > { %v617_v30 = vsel %vm1806_vm8, %v615_v26, 0.0  ;;  %v616_v31 = vadd.f32 %v613_v22, %v608_v29 }
 0x130   : > { %619 = vst [vmem:[#allocation2] sm:$0xf] %v617_v30 }
 0x131   : > { %v618_v32 = vsel %vm1810_vm10, %v616_v31, 0.0 }
 0x132   : > { %620 = vst [vmem:[#allocation2 + $0x8] sm:$0xf] %v618_v32 }
 0x137   : > { %v627_v35 = vld [vmem:[#allocation2] sm:$0xff] }
 0x139   : > { %v628_v33 = vld [vmem:[#allocation2 + $0x8] sm:$0xff] }
 0x13a   : > { %663 = vmatprep.subr.mxu0 %v628_v33  ;;  %748 = vmatprep.subr.mxu1 %v628_v33 }
 0x13b   : > { %664 = vmatpush1.msra.mxu0 %v627_v35  ;;  %749 = vmatpush1.msra.mxu1 %v627_v35 }
 0x13c   : > { %1301 = vmatmul.mubr.msk.f32.vlgmr.msra.gmra.mxu0 %vm456_vm0, %v629_v34  ;;  %826 = vmatprep.subr.mxu0 %v628_v33 }
 0x13d   : > { %827 = vmatpush1.msra.mxu0 %v627_v35  ;;  %860 = vmatprep.mubr.f32.mxu0 %v1592_v0 }
 0x13e   : > { %1302 = vmatmul.mubr.msk.f32.vlgmr.msra.gmra.mxu1 %vm456_vm0, %v714_v36 }
 0x13f   : > { %964 = vmatprep.mubr.f32.mxu1 %v1592_v0 }
 0x140   : > { %1303 = vmatmul.mubr.msk.f32.vlgmr.msra.gmra.mxu0 %vm456_vm0, %v792_v37  ;;  %vm893_vm0 = vcmask 1043456  }
 0x141   : > { %1048 = vmatprep.mubr.f32.mxu0 %v1592_v0 }
 0x1fc   : > { %v699_v38 = vpop.f32.mrf.mxu0 }
 0x1fd   : > { %704 = vrot.lane.b32.xlu0 %v699_v38, %s1594_s20 }
 0x1fe   : > { %v701_v39 = vpop.f32.mrf.mxu0  ;;  %v784_v44 = vpop.f32.mrf.mxu1 }
 0x1ff   : > { %706 = vrot.lane.b32.xlu1 %v701_v39, %s1594_s20 }
 0x200   : > { %v862_v40 = vpop.f32.mrf.mxu0  ;;  %v786_v49 = vpop.f32.mrf.mxu1 }
 0x201   : > { %867 = vrot.lane.b32.xlu0 %v862_v40, %s1595_s15 }
 0x202   : > { %v864_v41 = vpop.f32.mrf.mxu0 }
 0x203   : > { %869 = vrot.lane.b32.xlu1 %v864_v41, %s1595_s15 }
 0x205   : > { %1144 = vperm.xlu0 %1403, %v1141_v42  }
 0x26f   : > { %v705_v45 = vpop.permute.xlu0 %704 }
 0x271   : > { %v707_v46 = vpop.permute.xlu1 %706 }
 0x272   : > { %v710_v47 = vsel %vm708_vm14, %v707_v46, %v705_v45  ;;  %v709_v48 = vsel %vm708_vm14, %v705_v45, %v707_v46 }
 0x273   : > { %v789_v50 = vadd.f32 %v784_v44, %v710_v47  ;;  %v790_v51 = vadd.f32 %v786_v49, %v709_v48  ;;  %v868_v52 = vpop.permute.xlu0 %867 }
 0x275   : > { %v870_v53 = vpop.permute.xlu1 %869 }
 0x276   : > { %v872_v54 = vsel %vm871_vm15, %v868_v52, %v870_v53  ;;  %v873_v55 = vsel %vm871_vm15, %v870_v53, %v868_v52 }
 0x277   : > { %v874_v56 = vadd.f32 %v872_v54, %v789_v50  ;;  %v875_v57 = vadd.f32 %v873_v55, %v790_v51 }
 0x279   : > { %v882_v58 = vadd.f32 %v880_v43, %v874_v56  ;;  %v883_v59 = vadd.f32 %v880_v43, %v875_v57 }
 0x27b   : > { %v884_v60 = vmax.f32 %v882_v58, 0.0  ;;  %v885_v61 = vmax.f32 %v883_v59, 0.0 }
 0x27d   : > { %v887_v62 = vsel %vm1810_vm10, %v885_v61, 0.0  ;;  %v886_v63 = vsel %vm1806_vm8, %v884_v60, 0.0 }
 0x27e   : > { %1304 = vmatprep.subr.msk.mxu1 %vm893_vm0, %v887_v62  ;;  %1307 = vmatprep.subr.msk.mxu0 %vm893_vm0, %v887_v62 }
 0x27f   : > { %1305 = vmatpush1.msk.msra.mxu1 %vm893_vm0, %v886_v63  ;;  %1308 = vmatpush1.msk.msra.mxu0 %vm893_vm0, %v886_v63 }
 0x280   : > { %1306 = vmatmul.mubr.msk.f32.vlgmr.msra.gmra.mxu1 %vm889_vm1, %v888_v1  ;;  %1310 = vmatprep.subr.msk.mxu1 %vm893_vm0, %v887_v62  ;;  %v1145_v8 = vpop.permute.xlu0 %1144 }
 0x281   : > { %1311 = vmatpush1.msk.msra.mxu1 %vm893_vm0, %v886_v63  ;;  %1126 = vmatprep.mubr.f32.mxu1 %v1592_v0 }
 0x282   : > { %1309 = vmatmul.mubr.msk.f32.vlgmr.msra.gmra.mxu0 %vm889_vm1, %v980_v2 }
 0x284   : > { %1312 = vmatmul.mubr.msk.f32.vlgmr.msra.gmra.mxu1 %vm889_vm1, %v1058_v3 }
 0x340   : > { %v966_v4 = vpop.f32.mrf.mxu1 }
 0x341   : > { %971 = vrot.lane.b32.xlu0 %v966_v4, %s1594_s20 }
 0x342   : > { %v968_v5 = vpop.f32.mrf.mxu1  ;;  %v1050_v9 = vpop.f32.mrf.mxu0 }
 0x343   : > { %973 = vrot.lane.b32.xlu1 %v968_v5, %s1594_s20 }
 0x344   : > { %v1128_v6 = vpop.f32.mrf.mxu1  ;;  %v1052_v14 = vpop.f32.mrf.mxu0 }
 0x346   : > { %v1130_v7 = vpop.f32.mrf.mxu1 }
 0x347   : > { %1133 = vrot.lane.b32.xlu1 %v1128_v6, %s1595_s15  ;;  %1135 = vrot.lane.b32.xlu0 %v1130_v7, %s1595_s15 }
 0x3b3   : > { %v972_v10 = vpop.permute.xlu0 %971 }
 0x3b5   : > { %v974_v0 = vpop.permute.xlu1 %973 }
 0x3b6   : > { %v976_v12 = vsel %vm708_vm14, %v974_v0, %v972_v10  ;;  %v975_v13 = vsel %vm708_vm14, %v972_v10, %v974_v0 }
 0x3b7   : > { %v1055_v15 = vadd.f32 %v1050_v9, %v976_v12  ;;  %v1056_v16 = vadd.f32 %v1052_v14, %v975_v13 }
 0x3b9   : > { %v1134_v17 = vpop.permute.xlu1 %1133  ;;  %v1136_v18 = vpop.permute.xlu0 %1135 }
 0x3ba   : > { %v1137_v19 = vsel %vm871_vm15, %v1134_v17, %v1136_v18  ;;  %v1138_v20 = vsel %vm871_vm15, %v1136_v18, %v1134_v17 }
 0x3bb   : > { %v1139_v21 = vadd.f32 %v1137_v19, %v1055_v15  ;;  %v1140_v22 = vadd.f32 %v1138_v20, %v1056_v16 }
 0x3bd   : > { %v1147_v23 = vadd.f32 %v1145_v8, %v1139_v21  ;;  %v1148_v24 = vadd.f32 %v1145_v8, %v1140_v22 }
 0x3bf   : > { %v1149_v25 = vmax.f32 %v1147_v23, 0.0  ;;  %v1150_v26 = vmax.f32 %v1148_v24, 0.0 }
 0x3c1   : > { %v1153_v27 = vcombine.low %v1149_v25, %v1150_v26 }
 0x3c3   : > { %1155 = vst [vmem:[%s381_s6] sm:$0xff] %v1153_v27 }
 0x3c4   : > { %1525 = shalt.err (!%p1522_p13)
}
 0x3c5   : > { %s1526_s20 = scalar_lea.hbm %s1169_s17, 128  ;;  %s1530_s26 = scalar_lea.hbm %s1906_s8, 256 }
 0x3c6   : > { %p1527_p1 = scmp.ne.s32.totalorder %s1169_s17, %s1526_s20  ;;  %p1531_p11 = scmp.lt.s32.totalorder %s1169_s17, %s1906_s8 }
 0x3c7   : > { %p1532_p2 = scmp.lt.s32.totalorder %s1530_s26, %s1526_s20 }
 0x3c8   : > { %p1528_p8 = pnand %p1527_p1, %p1934_p12 }
 0x3c9   : > { %p1533_p4 = por %p1532_p2, %p1531_p11 }
 0x3ca   : > { %p1529_p10 = pneg %p1528_p8 }
 0x3cc   : > { %p1534_p6 = pnand %p1533_p4, %p1529_p10 }
 0x3ce   : > { %1537 = shalt.err (!%p1534_p6)
}
 0x3cf   : > { %1334 = dma.vmem_to_hbm [thread:$0]  (%p1934_p12), %s1172_s11, 128, %s1169_s17, %s1157_s19  }
 0x3d0 PF: > { %s1183_s4 = sand.u32 1, %s1572_s27   ;;  %p1935_p0 = scmp.ne.s32.totalorder %s1915_s12, 0 }
 0x3d1   : > { %p1936_p5 = scmp.ge.s32.totalorder %s1584_s30, 2  ;;  %s1184_s6 = scalar_lea.sflag [#allocation5], %s1183_s4 }
 0x3d3   : > { %p1351_p3 = pnand %p1936_p5, %p1935_p0 }
 0x3d5   : > { %p1352_p7 = pneg %p1351_p3 }
 0x3d7   : > { %1567 = dma.done.wait (%p1352_p7), %s1184_s6, 128  }
 0x3d8   : > { %1569 = vsyncadd (%p1352_p7), %s1184_s6, 4294967168  ;;  %p23_p9 = scmp.ge.s32.totalorder %s1722_s18, 4   ;;  %s1937_s27 = smov %s1576_s28 }
 0x3d9   : > { %s1938_s28 = smov %s1580_s29  ;;  %s1939_s29 = smov %s1732_s24 }
 0x3da   : > { %s1940_s30 = smov %s1722_s18  ;;  %25 = sbr.rel (!%p23_p9) target bundleno = 11 (0xb), region = 117 }
 0x3df   :  { %1189 = vsyncpa [#allocation4], 1 }
 0x3e0   :  { %1191 = vsyncpa [#allocation4 + $0x1], 1 }
 0x3e1   :  { %1192 = vsyncpa [#allocation7], 1 }
 0x3e2   :  { %1193 = vsyncpa [#allocation10], 1 }
 0x3e3   :  { %1194 = vsyncpa [#allocation5], 1 }
 0x3e4   :  { %1196 = vsyncpa [#allocation5 + $0x1], 1 }

</bundles_post_ra>
